<compile_context>
chip_gen: v6e
topology: v6e:2x2x1
jax: 0.10.0
libtpu: 0.0.40
codegen_flags: <defaults>
</compile_context>

<pallas_src>
import inspect

import jax
import jax.numpy as jnp
from jax.experimental import pallas as pl
from jax.experimental.pallas import tpu as pltpu


_LANE = 128          # vreg lane width: last-dim alignment target
_SUBLANE_BF16 = 16   # bf16 sublane packing: batch-tile alignment target


def _round_up(n, m):
    return ((n + m - 1) // m) * m


def _vmem_capacity_bytes():
    """Generation-aware VMEM capacity (128 MiB on v5e/v6e, 64 MiB per TC on v7x)."""
    try:
        return int(pltpu.get_tpu_info().vmem_capacity_bytes)
    except Exception:
        # Capability probe only (e.g. emulator); fall back to the smallest
        # (v7x-sized) capacity so the derived tiling is always safe.
        return 64 << 20


def _supports_buffered_specs():
    """Explicit capability check for BlockSpec(pipeline_mode=pl.Buffered(1))."""
    try:
        return (hasattr(pl, "Buffered")
                and "pipeline_mode" in inspect.signature(pl.BlockSpec).parameters)
    except (TypeError, ValueError):
        return False


_HAS_PIPELINE_MODE = _supports_buffered_specs()


def _make_head_kernel(n_layers, compute_dtype):
    """Build a kernel closed over the (static) number of linear layers."""

    def kernel(*refs):
        # refs = (res_ref, x_ref, w0, b0, w1, b1, ..., out_ref)
        res_ref = refs[0]          # SMEM (1,) f32 residual ratio
        x_ref = refs[1]            # (tb, D_pad) embeddings tile (VMEM)
        out_ref = refs[-1]         # (tb, D_pad) output tile (VMEM)
        wb_refs = refs[2:-1]

        # MLP stack: matmul in compute_dtype (bf16 -> MXU peak), f32 accumulation,
        # bias + ReLU on the f32 accumulator, cast back down between layers.
        h = x_ref[...].astype(compute_dtype)
        for i in range(n_layers):
            w = wb_refs[2 * i][...]                       # (d_in_pad, d_out_pad), compute_dtype
            b = wb_refs[2 * i + 1][...]                   # (1, d_out_pad), f32
            acc = jnp.dot(h, w, preferred_element_type=jnp.float32) + b
            acc = jnp.maximum(acc, 0.0)                   # ReLU after every Linear
            h = acc if i == n_layers - 1 else acc.astype(compute_dtype)

        # Residual blend: out = x + r*(h - x)  (== r*h + (1-r)*x, one fewer VPU mul).
        # Re-read x here (cheap vld from the already-resident VMEM tile) instead of
        # keeping an f32 copy live across the whole matmul chain.
        r = res_ref[0]
        x = x_ref[...].astype(jnp.float32)
        out_ref[...] = (x + r * (h - x)).astype(out_ref.dtype)

    return kernel


def _pad_params(weights, biases, compute_dtype, lane=_LANE):
    """Zero-pad every layer width (including the input/output width D) to a
    multiple of `lane` and cast weights to compute_dtype.

    Exactly preserves the math: padded output columns have weight 0 and bias 0, so
    they produce ReLU(0)=0, and the matching (zero) input rows of the next layer
    contribute nothing. Biases stay f32 (they are added to the f32 accumulator).
    """
    padded_w, padded_b = [], []
    d_in_pad = _round_up(weights[0].shape[0], lane)       # input width D, lane-padded
    for w, b in zip(weights, biases):
        d_in, d_out = w.shape
        d_out_pad = _round_up(d_out, lane)
        w_p = jnp.zeros((d_in_pad, d_out_pad), jnp.float32).at[:d_in, :d_out].set(
            w.astype(jnp.float32))
        b_p = jnp.zeros((1, d_out_pad), jnp.float32).at[0, :d_out].set(
            b.astype(jnp.float32))
        padded_w.append(w_p.astype(compute_dtype))
        padded_b.append(b_p)
        d_in_pad = d_out_pad
    return padded_w, padded_b


def _pick_batch_tile(B, batch_tile, act_budget_bytes, per_row_bytes):
    """Choose the batch tile from the per-generation VMEM activation budget."""
    if batch_tile is not None:
        tb = max(1, min(int(batch_tile), B))
    else:
        tb_vmem = max(_SUBLANE_BF16, act_budget_bytes // max(per_row_bytes, 1))
        tb = min(B, 1024, int(tb_vmem))
        if B > 256:
            # Keep >= 2 grid steps so the 'parallel' axis actually shards across
            # both TensorCores on v7x (and the pipeline has something to overlap).
            tb = min(tb, pl.cdiv(B, 2))
    if tb >= B:
        return B
    tb = _round_up(tb, _SUBLANE_BF16)     # bf16 sublane packing
    return B if tb >= B else tb


def residual_dynamic_head(embeddings, residual, weights, biases, *,
                          batch_tile=None, compute_dtype=jnp.bfloat16):
    """Fused forward pass of ResidualDynamicHead.

    embeddings: (B, D) array.
    residual:   scalar (the nn.Parameter `self.residual`).
    weights:    list of (d_in, d_out) matrices (already transposed vs PyTorch (out,in)).
    biases:     list of (d_out,) vectors.
    NOTE: output dtype == embeddings.dtype (internal compute is bf16 matmul / f32 else).
    """
    B, D = embeddings.shape
    n_layers = len(weights)
    assert n_layers == len(biases)

    D_pad = _round_up(D, _LANE)
    weights_p, biases_p = _pad_params(weights, biases, compute_dtype)
    res_arr = jnp.asarray(residual, jnp.float32).reshape(1)

    x = embeddings
    if D_pad != D:
        # Lane-pad the feature dim so stores are unmasked (vst, not vst.msk) and the
        # first/last matmuls are K/N-dense; padded columns stay exactly zero end-to-end.
        x = jnp.pad(embeddings, ((0, 0), (0, D_pad - D)))

    # ---- VMEM accounting (generation-aware) -------------------------------------
    io_itemsize = jnp.dtype(embeddings.dtype).itemsize
    w_bytes = sum(int(w.size) * jnp.dtype(compute_dtype).itemsize for w in weights_p)
    b_bytes = sum(int(b.size) * 4 for b in biases_p)
    weight_mult = 1 if _HAS_PIPELINE_MODE else 2   # Buffered(1) halves resident weights
    weight_resident = weight_mult * (w_bytes + b_bytes)

    max_width = max([D_pad] + [int(w.shape[1]) for w in weights_p])
    # 2 (in + out) x 2 (double-buffered) I/O tiles + ~3 f32 intermediate slabs per row.
    per_row_bytes = 2 * 2 * D_pad * io_itemsize + 3 * max_width * 4

    vmem_cap = int(0.85 * _vmem_capacity_bytes())
    # TODO(synk): when weight_resident approaches vmem_cap (several 4096x4096 bf16
    # layers), add a weight-streaming path (extra grid axis over output columns, or
    # pltpu.emit_pipeline over pl.ANY weight tiles) instead of keeping the full
    # stack resident in VMEM.
    act_budget = max(vmem_cap - weight_resident - (2 << 20),
                     per_row_bytes * _SUBLANE_BF16)

    tb = _pick_batch_tile(B, batch_tile, act_budget, per_row_bytes)
    grid = (pl.cdiv(B, tb),)

    footprint = weight_resident + tb * per_row_bytes
    vmem_limit = int(min(vmem_cap, max(32 << 20, int(1.25 * footprint) + (2 << 20))))

    # ---- specs / pallas_call ------------------------------------------------------
    kernel = _make_head_kernel(n_layers, compute_dtype)
    out_shape = jax.ShapeDtypeStruct((B, D_pad), embeddings.dtype)

    def _const_spec(shape):
        # Grid-invariant block (weights/biases): single-buffer when supported.
        if _HAS_PIPELINE_MODE:
            return pl.BlockSpec(shape, lambda i: (0, 0), pipeline_mode=pl.Buffered(1))
        return pl.BlockSpec(shape, lambda i: (0, 0))

    in_specs = [
        pl.BlockSpec(memory_space=pltpu.MemorySpace.SMEM),   # residual scalar
        pl.BlockSpec((tb, D_pad), lambda i: (i, 0)),          # embeddings tile
    ]
    for w, b in zip(weights_p, biases_p):
        in_specs.append(_const_spec(w.shape))
        in_specs.append(_const_spec(b.shape))

    flops = 2 * B * sum(int(w.shape[0]) * int(w.shape[1]) for w in weights_p)
    bytes_accessed = 2 * B * D_pad * io_itemsize + w_bytes + b_bytes
    cost = pl.CostEstimate(flops=flops, transcendentals=0,
                           bytes_accessed=bytes_accessed)

    call = pl.pallas_call(
        kernel,
        out_shape=out_shape,
        grid_spec=pltpu.PrefetchScalarGridSpec(
            num_scalar_prefetch=0,
            grid=grid,
            in_specs=in_specs,
            out_specs=pl.BlockSpec((tb, D_pad), lambda i: (i, 0)),
        ),
        compiler_params=pltpu.CompilerParams(
            dimension_semantics=("parallel",),
            vmem_limit_bytes=vmem_limit,
        ),
        cost_estimate=cost,
    )

    args = [res_arr, x]
    for w, b in zip(weights_p, biases_p):
        args.extend([w, b])
    out = call(*args)
    if D_pad != D:
        out = out[:, :D]
    return out


def init_params(key, in_dim, bottleneck_factor, pre_bottleneck_depth):
    """Deterministic synthetic init matching the PyTorch layer shapes (weights (in,out))."""
    dims = [(in_dim, in_dim) for _ in range(pre_bottleneck_depth)]
    dims.append((in_dim, in_dim // bottleneck_factor))
    dims.append((in_dim // bottleneck_factor, in_dim))

    weights, biases = [], []
    for d_in, d_out in dims:
        key, kw, kb = jax.random.split(key, 3)
        bound = 1.0 / (d_in ** 0.5)
        # PyTorch default Linear init: U(-1/sqrt(fan_in), 1/sqrt(fan_in))
        w = jax.random.uniform(kw, (d_in, d_out), jnp.float32, -bound, bound)
        b = jax.random.uniform(kb, (d_out,), jnp.float32, -bound, bound)
        weights.append(w)
        biases.append(b)
    return weights, biases


def reference_forward(embeddings, residual, weights, biases, compute_dtype=jnp.float32):
    """Pure-JAX reference mirroring the PyTorch forward (optionally bf16 matmuls)."""
    x = embeddings.astype(jnp.float32)
    h = x
    for w, b in zip(weights, biases):
        h = jnp.dot(h.astype(compute_dtype), w.astype(compute_dtype),
                    preferred_element_type=jnp.float32) + b
        h = jnp.maximum(h, 0.0)
    return residual * h + (1.0 - residual) * x


if __name__ == "__main__":
    # Module hyper-params (synthetic, small)
    in_dim = 32
    initial_residual_ratio = 0.25
    bottleneck_factor = 4
    pre_bottleneck_depth = 2
    batch = 8

    key = jax.random.PRNGKey(0)
    key, kx = jax.random.split(key)
    embeddings = jax.random.normal(kx, (batch, in_dim), jnp.float32)

    weights, biases = init_params(key, in_dim, bottleneck_factor, pre_bottleneck_depth)
    residual = jnp.float32(initial_residual_ratio)

    out = residual_dynamic_head(embeddings, residual, weights, biases)
    out = jax.block_until_ready(out)
    assert out.shape == embeddings.shape

    # Matched-precision reference (bf16 matmul, f32 accumulation): tight tolerance.
    ref_bf16 = reference_forward(embeddings, residual, weights, biases,
                                 compute_dtype=jnp.bfloat16)
    assert jnp.allclose(out, ref_bf16, atol=1e-3, rtol=1e-3), (
        float(jnp.max(jnp.abs(out - ref_bf16))))

    # Full-f32 reference (exact PyTorch semantics): loose tolerance (bf16 weight rounding).
    ref_f32 = reference_forward(embeddings, residual, weights, biases,
                                compute_dtype=jnp.float32)
    assert jnp.allclose(out, ref_f32, atol=5e-2, rtol=5e-2), (
        float(jnp.max(jnp.abs(out - ref_f32))))

    print("KERNEL_OK")
</pallas_src>

<mosaic_0001>
module attributes {stable_mosaic.version = 11 : i64} {
  func.func @kernel(%arg0: i32, %arg1: memref<1xf32, #tpu.memory_space<smem>>, %arg2: memref<8x128xf32, #tpu.memory_space<vmem>>, %arg3: memref<128x128xbf16, #tpu.memory_space<vmem>>, %arg4: memref<1x128xf32, #tpu.memory_space<vmem>>, %arg5: memref<128x128xbf16, #tpu.memory_space<vmem>>, %arg6: memref<1x128xf32, #tpu.memory_space<vmem>>, %arg7: memref<128x128xbf16, #tpu.memory_space<vmem>>, %arg8: memref<1x128xf32, #tpu.memory_space<vmem>>, %arg9: memref<128x128xbf16, #tpu.memory_space<vmem>>, %arg10: memref<1x128xf32, #tpu.memory_space<vmem>>, %arg11: memref<8x128xf32, #tpu.memory_space<vmem>>) attributes {dimension_semantics = [#tpu.dimension_semantics<parallel>], iteration_bounds = array<i64: 1>, scalar_prefetch = 0 : i64, scratch_operands = 0 : i64, tpu.core_type = #tpu.core_type<tc>, window_params = [{transform_indices = @transform_0, window_bounds = array<i64: 1>}, {transform_indices = @transform_1, window_bounds = array<i64: 8, 128>}, {pipeline_mode = #tpu.pipeline_mode<synchronous>, transform_indices = @transform_2, window_bounds = array<i64: 128, 128>}, {pipeline_mode = #tpu.pipeline_mode<synchronous>, transform_indices = @transform_3, window_bounds = array<i64: 1, 128>}, {pipeline_mode = #tpu.pipeline_mode<synchronous>, transform_indices = @transform_4, window_bounds = array<i64: 128, 128>}, {pipeline_mode = #tpu.pipeline_mode<synchronous>, transform_indices = @transform_5, window_bounds = array<i64: 1, 128>}, {pipeline_mode = #tpu.pipeline_mode<synchronous>, transform_indices = @transform_6, window_bounds = array<i64: 128, 128>}, {pipeline_mode = #tpu.pipeline_mode<synchronous>, transform_indices = @transform_7, window_bounds = array<i64: 1, 128>}, {pipeline_mode = #tpu.pipeline_mode<synchronous>, transform_indices = @transform_8, window_bounds = array<i64: 128, 128>}, {pipeline_mode = #tpu.pipeline_mode<synchronous>, transform_indices = @transform_9, window_bounds = array<i64: 1, 128>}, {transform_indices = @transform_10, window_bounds = array<i64: 8, 128>}]} {
    %c0 = arith.constant 0 : index
    %c0_0 = arith.constant 0 : index
    %0 = vector.load %arg2[%c0, %c0_0] : memref<8x128xf32, #tpu.memory_space<vmem>>, vector<8x128xf32>
    %1 = arith.truncf %0 : vector<8x128xf32> to vector<8x128xbf16>
    %c0_1 = arith.constant 0 : index
    %c0_2 = arith.constant 0 : index
    %2 = vector.load %arg3[%c0_1, %c0_2] : memref<128x128xbf16, #tpu.memory_space<vmem>>, vector<128x128xbf16>
    %c0_3 = arith.constant 0 : index
    %c0_4 = arith.constant 0 : index
    %3 = vector.load %arg4[%c0_3, %c0_4] : memref<1x128xf32, #tpu.memory_space<vmem>>, vector<1x128xf32>
    %cst = arith.constant dense<0.000000e+00> : vector<8x128xf32>
    %4 = tpu.matmul %1, %2, %cst {dimension_numbers = #tpu.dot_dimension_numbers<[1], [0], [0], [1], [0, 0, 1, 1], [], []>} : vector<8x128xbf16>, vector<128x128xbf16>, vector<8x128xf32> -> vector<8x128xf32>
    %5 = vector.broadcast %3 : vector<1x128xf32> to vector<8x128xf32>
    %6 = arith.addf %4, %5 : vector<8x128xf32>
    %cst_5 = arith.constant 0.000000e+00 : f32
    %7 = vector.broadcast %cst_5 : f32 to vector<8x128xf32>
    %8 = arith.maximumf %6, %7 : vector<8x128xf32>
    %9 = arith.truncf %8 : vector<8x128xf32> to vector<8x128xbf16>
    %c0_6 = arith.constant 0 : index
    %c0_7 = arith.constant 0 : index
    %10 = vector.load %arg5[%c0_6, %c0_7] : memref<128x128xbf16, #tpu.memory_space<vmem>>, vector<128x128xbf16>
    %c0_8 = arith.constant 0 : index
    %c0_9 = arith.constant 0 : index
    %11 = vector.load %arg6[%c0_8, %c0_9] : memref<1x128xf32, #tpu.memory_space<vmem>>, vector<1x128xf32>
    %cst_10 = arith.constant dense<0.000000e+00> : vector<8x128xf32>
    %12 = tpu.matmul %9, %10, %cst_10 {dimension_numbers = #tpu.dot_dimension_numbers<[1], [0], [0], [1], [0, 0, 1, 1], [], []>} : vector<8x128xbf16>, vector<128x128xbf16>, vector<8x128xf32> -> vector<8x128xf32>
    %13 = vector.broadcast %11 : vector<1x128xf32> to vector<8x128xf32>
    %14 = arith.addf %12, %13 : vector<8x128xf32>
    %cst_11 = arith.constant 0.000000e+00 : f32
    %15 = vector.broadcast %cst_11 : f32 to vector<8x128xf32>
    %16 = arith.maximumf %14, %15 : vector<8x128xf32>
    %17 = arith.truncf %16 : vector<8x128xf32> to vector<8x128xbf16>
    %c0_12 = arith.constant 0 : index
    %c0_13 = arith.constant 0 : index
    %18 = vector.load %arg7[%c0_12, %c0_13] : memref<128x128xbf16, #tpu.memory_space<vmem>>, vector<128x128xbf16>
    %c0_14 = arith.constant 0 : index
    %c0_15 = arith.constant 0 : index
    %19 = vector.load %arg8[%c0_14, %c0_15] : memref<1x128xf32, #tpu.memory_space<vmem>>, vector<1x128xf32>
    %cst_16 = arith.constant dense<0.000000e+00> : vector<8x128xf32>
    %20 = tpu.matmul %17, %18, %cst_16 {dimension_numbers = #tpu.dot_dimension_numbers<[1], [0], [0], [1], [0, 0, 1, 1], [], []>} : vector<8x128xbf16>, vector<128x128xbf16>, vector<8x128xf32> -> vector<8x128xf32>
    %21 = vector.broadcast %19 : vector<1x128xf32> to vector<8x128xf32>
    %22 = arith.addf %20, %21 : vector<8x128xf32>
    %cst_17 = arith.constant 0.000000e+00 : f32
    %23 = vector.broadcast %cst_17 : f32 to vector<8x128xf32>
    %24 = arith.maximumf %22, %23 : vector<8x128xf32>
    %25 = arith.truncf %24 : vector<8x128xf32> to vector<8x128xbf16>
    %c0_18 = arith.constant 0 : index
    %c0_19 = arith.constant 0 : index
    %26 = vector.load %arg9[%c0_18, %c0_19] : memref<128x128xbf16, #tpu.memory_space<vmem>>, vector<128x128xbf16>
    %c0_20 = arith.constant 0 : index
    %c0_21 = arith.constant 0 : index
    %27 = vector.load %arg10[%c0_20, %c0_21] : memref<1x128xf32, #tpu.memory_space<vmem>>, vector<1x128xf32>
    %cst_22 = arith.constant dense<0.000000e+00> : vector<8x128xf32>
    %28 = tpu.matmul %25, %26, %cst_22 {dimension_numbers = #tpu.dot_dimension_numbers<[1], [0], [0], [1], [0, 0, 1, 1], [], []>} : vector<8x128xbf16>, vector<128x128xbf16>, vector<8x128xf32> -> vector<8x128xf32>
    %29 = vector.broadcast %27 : vector<1x128xf32> to vector<8x128xf32>
    %30 = arith.addf %28, %29 : vector<8x128xf32>
    %cst_23 = arith.constant 0.000000e+00 : f32
    %31 = vector.broadcast %cst_23 : f32 to vector<8x128xf32>
    %32 = arith.maximumf %30, %31 : vector<8x128xf32>
    %c0_24 = arith.constant 0 : index
    %33 = memref.load %arg1[%c0_24] : memref<1xf32, #tpu.memory_space<smem>>
    %c0_25 = arith.constant 0 : index
    %c0_26 = arith.constant 0 : index
    %34 = vector.load %arg2[%c0_25, %c0_26] : memref<8x128xf32, #tpu.memory_space<vmem>>, vector<8x128xf32>
    %35 = arith.subf %32, %34 : vector<8x128xf32>
    %36 = vector.broadcast %33 : f32 to vector<8x128xf32>
    %37 = arith.mulf %36, %35 : vector<8x128xf32>
    %38 = arith.addf %34, %37 : vector<8x128xf32>
    %c0_27 = arith.constant 0 : index
    %c0_28 = arith.constant 0 : index
    %39 = vector.load %arg11[%c0_27, %c0_28] : memref<8x128xf32, #tpu.memory_space<vmem>>, vector<8x128xf32>
    tpu.vector_store %arg11[%c0_27, %c0_28], %38 {strides = array<i32>} : memref<8x128xf32, #tpu.memory_space<vmem>>, vector<8x128xf32>,
    return
  }
  func.func @transform_0(%arg0: i32) -> i32 {
    %c0_i32 = arith.constant 0 : i32
    %c0_i32_0 = arith.constant 0 : i32
    return %c0_i32 : i32
  }
  func.func @transform_1(%arg0: i32) -> (i32, i32) {
    %c0_i32 = arith.constant 0 : i32
    %c0_i32_0 = arith.constant 0 : i32
    return %arg0, %c0_i32 : i32, i32
  }
  func.func @transform_2(%arg0: i32) -> (i32, i32) {
    %c0_i32 = arith.constant 0 : i32
    %c0_i32_0 = arith.constant 0 : i32
    %c0_i32_1 = arith.constant 0 : i32
    return %c0_i32, %c0_i32_0 : i32, i32
  }
  func.func @transform_3(%arg0: i32) -> (i32, i32) {
    %c0_i32 = arith.constant 0 : i32
    %c0_i32_0 = arith.constant 0 : i32
    %c0_i32_1 = arith.constant 0 : i32
    return %c0_i32, %c0_i32_0 : i32, i32
  }
  func.func @transform_4(%arg0: i32) -> (i32, i32) {
    %c0_i32 = arith.constant 0 : i32
    %c0_i32_0 = arith.constant 0 : i32
    %c0_i32_1 = arith.constant 0 : i32
    return %c0_i32, %c0_i32_0 : i32, i32
  }
  func.func @transform_5(%arg0: i32) -> (i32, i32) {
    %c0_i32 = arith.constant 0 : i32
    %c0_i32_0 = arith.constant 0 : i32
    %c0_i32_1 = arith.constant 0 : i32
    return %c0_i32, %c0_i32_0 : i32, i32
  }
  func.func @transform_6(%arg0: i32) -> (i32, i32) {
    %c0_i32 = arith.constant 0 : i32
    %c0_i32_0 = arith.constant 0 : i32
    %c0_i32_1 = arith.constant 0 : i32
    return %c0_i32, %c0_i32_0 : i32, i32
  }
  func.func @transform_7(%arg0: i32) -> (i32, i32) {
    %c0_i32 = arith.constant 0 : i32
    %c0_i32_0 = arith.constant 0 : i32
    %c0_i32_1 = arith.constant 0 : i32
    return %c0_i32, %c0_i32_0 : i32, i32
  }
  func.func @transform_8(%arg0: i32) -> (i32, i32) {
    %c0_i32 = arith.constant 0 : i32
    %c0_i32_0 = arith.constant 0 : i32
    %c0_i32_1 = arith.constant 0 : i32
    return %c0_i32, %c0_i32_0 : i32, i32
  }
  func.func @transform_9(%arg0: i32) -> (i32, i32) {
    %c0_i32 = arith.constant 0 : i32
    %c0_i32_0 = arith.constant 0 : i32
    %c0_i32_1 = arith.constant 0 : i32
    return %c0_i32, %c0_i32_0 : i32, i32
  }
  func.func @transform_10(%arg0: i32) -> (i32, i32) {
    %c0_i32 = arith.constant 0 : i32
    %c0_i32_0 = arith.constant 0 : i32
    return %arg0, %c0_i32 : i32, i32
  }
}

</mosaic_0001>

<bundles_post_ra>
// kernel: tpu_custom_call.1
= control target key start
LH: loop header
LB: loop body
LE: loop exit
PB: predicated region body
PF: predicated region fallthrough
CT: control target
= control target key end

     0   :  { %16 = vsyncpa [#allocation4], 0  ;;  %s1058_s0 = inlined_call_operand.<no memory space> [shape: f32[1], index: 0, kind: input, shape index: {}]   ;;  %s1059_s1 = inlined_call_operand.hbm [shape: f32[8,128], index: 1, kind: input, shape index: {}]   ;;  %s1060_s2 = inlined_call_operand.hbm [shape: bf16[128,128], index: 2, kind: input, shape index: {}]   ;;  %s1061_s3 = inlined_call_operand.vmem [shape: f32[1,128], index: 3, kind: input, shape index: {}]   ;;  %s1062_s4 = inlined_call_operand.hbm [shape: bf16[128,128], index: 4, kind: input, shape index: {}]   ;;  %s1063_s5 = inlined_call_operand.vmem [shape: f32[1,128], index: 5, kind: input, shape index: {}]   ;;  %s1064_s6 = inlined_call_operand.hbm [shape: bf16[128,128], index: 6, kind: input, shape index: {}]   ;;  %s1065_s7 = inlined_call_operand.vmem [shape: f32[1,128], index: 7, kind: input, shape index: {}]   ;;  %s1066_s8 = inlined_call_operand.hbm [shape: bf16[128,128], index: 8, kind: input, shape index: {}]   ;;  %s1067_s9 = inlined_call_operand.vmem [shape: f32[1,128], index: 9, kind: input, shape index: {}]   ;;  %s1068_s10 = inlined_call_operand.hbm [shape: f32[8,128], index: 10, kind: output, shape index: {}]  }
   0x1   :  { %17 = vsyncpa [#allocation7], 0 }
   0x2   :  { %18 = vsyncpa [#allocation10], 0 }
   0x3   :  { %19 = vsyncpa [#allocation5], 0  ;;  %s902_s13 = smov [#allocation6]  }
   0x4   :  { %s37_s14 = sshll.u32 %s902_s13, 4  ;;  %s38_s14 = int_to_ptr.vmem [resolvable:$true] %s37_s14 }
   0x5   :  { %s782_s15 = scalar_lea.vmem %s38_s14, 1024  ;;  %p787_p1 = scmp.lt.s32.totalorder %s38_s14, %s38_s14 }
   0x6   :  { %p783_p0 = scmp.ne.s32.totalorder %s38_s14, %s782_s15  ;;  %p788_p2 = scmp.lt.s32.totalorder %s782_s15, %s782_s15 }
   0x8   :  { %p789_p3 = por %p788_p2, %p787_p1 }
   0xa   :  { %p790_p4 = pnand %p789_p3, %p783_p0 }
   0xc   :  { %793 = shalt.err (!%p790_p4)
}
   0xd   :  { %s903_s16 = smov 64   ;;  %s904_s17 = smov 4  }
   0xe   :  { %43 = dma.hbm_to_vmem [thread:$0]  %s1060_s2, 1024, %s38_s14, [#allocation7], %s903_s16, %s903_s16, %s904_s17  }
   0xf   :  { %s905_s20 = smov [#allocation9]   ;;  %s906_s22 = smov [#allocation3]  }
  0x10   :  { %s65_s21 = sshll.u32 %s905_s20, 4  ;;  %s28_s23 = sshll.u32 %s906_s22, 4  ;;  %s66_s21 = int_to_ptr.vmem [resolvable:$true] %s65_s21  ;;  %s29_s23 = int_to_ptr.vmem [resolvable:$true] %s28_s23 }
  0x11   :  { %s802_s24 = scalar_lea.vmem %s66_s21, 1024  ;;  %p807_p6 = scmp.lt.s32.totalorder %s66_s21, %s66_s21 }
  0x12   :  { %p803_p5 = scmp.ne.s32.totalorder %s66_s21, %s802_s24  ;;  %p808_p7 = scmp.lt.s32.totalorder %s802_s24, %s802_s24 }
  0x14   :  { %p809_p8 = por %p808_p7, %p807_p6 }
  0x16   :  { %p810_p9 = pnand %p809_p8, %p803_p5 }
  0x18   :  { %813 = shalt.err (!%p810_p9)
}
  0x19   :  { %71 = dma.hbm_to_vmem [thread:$0]  %s1064_s6, 1024, %s66_s21, [#allocation10], %s903_s16, %s903_s16, %s904_s17  }
  0x1a   :  { %s822_s2 = scalar_lea.vmem %s29_s23, 128  ;;  %p827_p11 = scmp.lt.s32.totalorder %s29_s23, %s29_s23 }
  0x1b   :  { %p823_p10 = scmp.ne.s32.totalorder %s29_s23, %s822_s2  ;;  %p828_p12 = scmp.lt.s32.totalorder %s822_s2, %s822_s2 }
  0x1d   :  { %p829_p13 = por %p828_p12, %p827_p11 }
  0x1f   :  { %p830_p0 = pnand %p829_p13, %p823_p10 }
  0x21   :  { %833 = shalt.err (!%p830_p0)
}
  0x22   :  { %31 = dma.hbm_to_vmem [thread:$0]  %s1059_s1, 128, %s29_s23, [#allocation4]  }
  0x23   :  { %s907_s29 = smov [#allocation8]   ;;  %s908_s11 = smov [#allocation11]  }
  0x24   :  { %s51_s30 = sshll.u32 %s907_s29, 4  ;;  %s79_s12 = sshll.u32 %s908_s11, 4  ;;  %s52_s30 = int_to_ptr.vmem [resolvable:$true] %s51_s30  ;;  %s80_s12 = int_to_ptr.vmem [resolvable:$true] %s79_s12 }
  0x25   :  { %s842_s13 = scalar_lea.vmem %s52_s30, 1024  ;;  %p847_p2 = scmp.lt.s32.totalorder %s52_s30, %s52_s30 }
  0x26   :  { %p843_p1 = scmp.ne.s32.totalorder %s52_s30, %s842_s13  ;;  %p848_p3 = scmp.lt.s32.totalorder %s842_s13, %s842_s13 }
  0x28   :  { %p849_p4 = por %p848_p3, %p847_p2 }
  0x2a   :  { %p850_p5 = pnand %p849_p4, %p843_p1 }
  0x2c   :  { %853 = shalt.err (!%p850_p5)
}
  0x2d   :  { %57 = dma.hbm_to_vmem [thread:$0]  %s1062_s4, 1024, %s52_s30, [#allocation7], %s903_s16, %s903_s16, %s904_s17  }
  0x2e   :  { %s862_s1 = scalar_lea.vmem %s80_s12, 1024  ;;  %p867_p7 = scmp.lt.s32.totalorder %s80_s12, %s80_s12 }
  0x2f   :  { %p863_p6 = scmp.ne.s32.totalorder %s80_s12, %s862_s1  ;;  %p868_p8 = scmp.lt.s32.totalorder %s862_s1, %s862_s1 }
  0x31   :  { %p869_p9 = por %p868_p8, %p867_p7 }
  0x33   :  { %p870_p10 = pnand %p869_p9, %p863_p6 }
  0x35   :  { %873 = shalt.err (!%p870_p10)
}
  0x36   :  { %85 = dma.hbm_to_vmem [thread:$0]  %s1066_s8, 1024, %s80_s12, [#allocation10], %s903_s16, %s903_s16, %s904_s17  }
  0x37   :  { %894 = dma.done.wait [#allocation4], 128  }
  0x38   :  { %895 = vsyncadd [#allocation4], 4294967168 }
  0x39   :  { %896 = dma.done.wait [#allocation7], 2048  }
  0x3a   :  { %897 = vsyncadd [#allocation7], 4294965248 }
  0x3b   :  { %898 = dma.done.wait [#allocation10], 2048  }
  0x3c   :  { %899 = vsyncadd [#allocation10], 4294965248  ;;  %v909_v0 = vmov 0.0   ;;  %vm910_vm0 = vmmov 0   ;;  %v742_v1 = vld [vmem:[#allocation6 + $0x38] sm:$0xff]   ;;  %v743_v2 = vld [vmem:[#allocation6 + $0x30] sm:$0xff]  }
  0x3d   :  { %652 = vmatprep.subr.bf16.mxu0 %v909_v0  ;;  %668 = vmatprep.mubr.msk.bf16.mxu0 %vm910_vm0, %v909_v0  ;;  %v744_v3 = vld [vmem:[#allocation6 + $0x28] sm:$0xff]   ;;  %v750_v4 = vld [vmem:[#allocation8 + $0x38] sm:$0xff]   ;;  %v745_v5 = vld [vmem:[#allocation6 + $0x20] sm:$0xff]  }
  0x3e   :  { %672 = vmatprep.subr.bf16.mxu1 %v909_v0  ;;  %688 = vmatprep.mubr.msk.bf16.mxu1 %vm910_vm0, %v909_v0  ;;  %v751_v6 = vld [vmem:[#allocation8 + $0x30] sm:$0xff]   ;;  %v746_v7 = vld [vmem:[#allocation6 + $0x18] sm:$0xff]   ;;  %v752_v8 = vld [vmem:[#allocation8 + $0x28] sm:$0xff]  }
  0x3f   :  { %653 = vmatpush3.bf16.msra.mxu0 %v742_v1  ;;  %673 = vmatpush3.bf16.msra.mxu1 %v750_v4  ;;  %v747_v9 = vld [vmem:[#allocation6 + $0x10] sm:$0xff]   ;;  %v753_v10 = vld [vmem:[#allocation8 + $0x20] sm:$0xff]   ;;  %v748_v11 = vld [vmem:[#allocation6 + $0x8] sm:$0xff]  }
  0x40   :  { %654 = vmatprep.subr.bf16.mxu0 %v909_v0  ;;  %674 = vmatprep.subr.bf16.mxu1 %v909_v0  ;;  %v754_v12 = vld [vmem:[#allocation8 + $0x18] sm:$0xff]   ;;  %v749_v13 = vld [vmem:[#allocation6] sm:$0xff]   ;;  %v755_v15 = vld [vmem:[#allocation8 + $0x10] sm:$0xff]  }
  0x41   :  { %v1010_v14 = vld [vmem:[#allocation3] sm:$0xff]  ;;  %v756_v17 = vld [vmem:[#allocation8 + $0x8] sm:$0xff]   ;;  %v757_v18 = vld [vmem:[#allocation8] sm:$0xff]  }
  0x42   :  { %v105_v16 = vpack.c.bf16 %v1010_v14, %v1010_v14  ;;  %v758_v19 = vld [vmem:[#allocation9 + $0x38] sm:$0xff]   ;;  %v759_v20 = vld [vmem:[#allocation9 + $0x30] sm:$0xff]   ;;  %v760_v21 = vld [vmem:[#allocation9 + $0x28] sm:$0xff]  }
  0x43   :  { %655 = vmatpush3.bf16.msra.mxu0 %v743_v2  ;;  %675 = vmatpush3.bf16.msra.mxu1 %v751_v6  ;;  %v761_v22 = vld [vmem:[#allocation9 + $0x20] sm:$0xff]   ;;  %v762_v23 = vld [vmem:[#allocation9 + $0x18] sm:$0xff]   ;;  %v763_v24 = vld [vmem:[#allocation9 + $0x10] sm:$0xff]  }
  0x44   :  { %656 = vmatprep.subr.bf16.mxu0 %v909_v0  ;;  %676 = vmatprep.subr.bf16.mxu1 %v909_v0  ;;  %v580_v25 = vld [vmem:[%s1061_s3] ss:$0 sm:$0xff]  ;;  %v764_v33 = vld [vmem:[#allocation9 + $0x8] sm:$0xff]   ;;  %v765_v34 = vld [vmem:[#allocation9] sm:$0xff]  }
  0x45   :  { %v766_v35 = vld [vmem:[#allocation11 + $0x38] sm:$0xff]   ;;  %v767_v36 = vld [vmem:[#allocation11 + $0x30] sm:$0xff]   ;;  %v768_v37 = vld [vmem:[#allocation11 + $0x28] sm:$0xff]  }
  0x46   :  { %v769_v38 = vld [vmem:[#allocation11 + $0x20] sm:$0xff]   ;;  %v770_v39 = vld [vmem:[#allocation11 + $0x18] sm:$0xff]   ;;  %v771_v40 = vld [vmem:[#allocation11 + $0x10] sm:$0xff]  }
  0x47   :  { %657 = vmatpush3.bf16.msra.mxu0 %v744_v3  ;;  %677 = vmatpush3.bf16.msra.mxu1 %v752_v8  ;;  %v589_v41 = vld [vmem:[%s1063_s5] ss:$0 sm:$0xff]  ;;  %v772_v49 = vld [vmem:[#allocation11 + $0x8] sm:$0xff]   ;;  %v773_v50 = vld [vmem:[#allocation11] sm:$0xff]  }
  0x48   :  { %658 = vmatprep.subr.bf16.mxu0 %v909_v0  ;;  %678 = vmatprep.subr.bf16.mxu1 %v909_v0  ;;  %v598_v51 = vld [vmem:[%s1065_s7] ss:$0 sm:$0xff]  ;;  %s911_s7 = smov [#allocation12]  }
  0x49   :  { %v607_v59 = vld [vmem:[%s1067_s9] ss:$0 sm:$0xff]  ;;  %s569_s23 = sshll.u32 %s911_s7, 4  ;;  %s570_s23 = int_to_ptr.vmem [resolvable:$true] %s569_s23 }
  0x4a   :  { %s874_s9 = scalar_lea.vmem %s570_s23, 128  ;;  %p879_p12 = scmp.lt.s32.totalorder %s570_s23, %s570_s23 }
  0x4b   :  { %659 = vmatpush3.bf16.msra.mxu0 %v745_v5  ;;  %679 = vmatpush3.bf16.msra.mxu1 %v753_v10  ;;  %p875_p11 = scmp.ne.s32.totalorder %s570_s23, %s874_s9  ;;  %p880_p13 = scmp.lt.s32.totalorder %s874_s9, %s874_s9 }
  0x4c   :  { %660 = vmatprep.subr.bf16.mxu0 %v909_v0  ;;  %680 = vmatprep.subr.bf16.mxu1 %v909_v0 }
  0x4d   :  { %p881_p0 = por %p880_p13, %p879_p12 }
  0x4f   :  { %661 = vmatpush3.bf16.msra.mxu0 %v746_v7  ;;  %681 = vmatpush3.bf16.msra.mxu1 %v754_v12  ;;  %p882_p1 = pnand %p881_p0, %p875_p11 }
  0x50   :  { %662 = vmatprep.subr.bf16.mxu0 %v909_v0  ;;  %682 = vmatprep.subr.bf16.mxu1 %v909_v0 }
  0x53   :  { %663 = vmatpush3.bf16.msra.mxu0 %v747_v9  ;;  %683 = vmatpush3.bf16.msra.mxu1 %v755_v15 }
  0x54   :  { %664 = vmatprep.subr.bf16.mxu0 %v909_v0  ;;  %684 = vmatprep.subr.bf16.mxu1 %v909_v0 }
  0x57   :  { %665 = vmatpush3.bf16.msra.mxu0 %v748_v11  ;;  %685 = vmatpush3.bf16.msra.mxu1 %v756_v17 }
  0x58   :  { %666 = vmatprep.subr.bf16.mxu0 %v909_v0  ;;  %686 = vmatprep.subr.bf16.mxu1 %v909_v0 }
  0x5b   :  { %667 = vmatpush3.bf16.msra.mxu0 %v749_v13  ;;  %687 = vmatpush3.bf16.msra.mxu1 %v757_v18 }
  0x5c   :  { %692 = vmatprep.subr.bf16.mxu0 %v909_v0  ;;  %712 = vmatprep.subr.bf16.mxu1 %v909_v0 }
  0x5e   :  { %669 = vmatmul.mubr.bf16.vlgmr.msra.gmra.mxu0 %v105_v16 }
  0x5f   :  { %708 = vmatprep.mubr.msk.bf16.mxu0 %vm910_vm0, %v909_v0  ;;  %693 = vmatpush3.bf16.msra.mxu0 %v758_v19 }
  0x60   :  { %694 = vmatprep.subr.bf16.mxu0 %v909_v0 }
  0x63   :  { %695 = vmatpush3.bf16.msra.mxu0 %v759_v20 }
  0x64   :  { %696 = vmatprep.subr.bf16.mxu0 %v909_v0 }
  0x67   :  { %697 = vmatpush3.bf16.msra.mxu0 %v760_v21 }
  0x68   :  { %698 = vmatprep.subr.bf16.mxu0 %v909_v0 }
  0x6b   :  { %699 = vmatpush3.bf16.msra.mxu0 %v761_v22 }
  0x6c   :  { %700 = vmatprep.subr.bf16.mxu0 %v909_v0 }
  0x6f   :  { %701 = vmatpush3.bf16.msra.mxu0 %v762_v23 }
  0x70   :  { %702 = vmatprep.subr.bf16.mxu0 %v909_v0 }
  0x73   :  { %703 = vmatpush3.bf16.msra.mxu0 %v763_v24 }
  0x74   :  { %704 = vmatprep.subr.bf16.mxu0 %v909_v0 }
  0x77   :  { %705 = vmatpush3.bf16.msra.mxu0 %v764_v33 }
  0x78   :  { %706 = vmatprep.subr.bf16.mxu0 %v909_v0 }
  0x7b   :  { %707 = vmatpush3.bf16.msra.mxu0 %v765_v34 }
 0x11e   :  { %v211_v26 = vpop.f32.mrf.mxu0 }
 0x11f   :  { %v212_v27 = vadd.f32 %v580_v25, %v211_v26 }
 0x120   :  { %v670_v28 = vpop.f32.mrf.mxu0 }
 0x121   :  { %v217_v29 = vmax.f32 %v212_v27, 0.0 }
 0x122   :  { %v214_v30 = vpop.f32.mrf.mxu0 }
 0x123   :  { %v218_v31 = vpack.c.bf16 %v217_v29, %v217_v29 }
 0x124   :  { %v671_v32 = vpop.f32.mrf.mxu0 }
 0x125   :  { %689 = vmatmul.mubr.bf16.vlgmr.msra.gmra.mxu1 %v218_v31 }
 0x126   :  { %728 = vmatprep.mubr.msk.bf16.mxu1 %vm910_vm0, %v909_v0  ;;  %713 = vmatpush3.bf16.msra.mxu1 %v766_v35 }
 0x127   :  { %714 = vmatprep.subr.bf16.mxu1 %v909_v0 }
 0x12a   :  { %715 = vmatpush3.bf16.msra.mxu1 %v767_v36 }
 0x12b   :  { %716 = vmatprep.subr.bf16.mxu1 %v909_v0 }
 0x12e   :  { %717 = vmatpush3.bf16.msra.mxu1 %v768_v37 }
 0x12f   :  { %718 = vmatprep.subr.bf16.mxu1 %v909_v0 }
 0x132   :  { %719 = vmatpush3.bf16.msra.mxu1 %v769_v38 }
 0x133   :  { %720 = vmatprep.subr.bf16.mxu1 %v909_v0 }
 0x136   :  { %721 = vmatpush3.bf16.msra.mxu1 %v770_v39 }
 0x137   :  { %722 = vmatprep.subr.bf16.mxu1 %v909_v0 }
 0x13a   :  { %723 = vmatpush3.bf16.msra.mxu1 %v771_v40 }
 0x13b   :  { %724 = vmatprep.subr.bf16.mxu1 %v909_v0 }
 0x13e   :  { %725 = vmatpush3.bf16.msra.mxu1 %v772_v49 }
 0x13f   :  { %726 = vmatprep.subr.bf16.mxu1 %v909_v0  ;;  %v559_v0 = vstv %s1058_s0 }
 0x142   :  { %727 = vmatpush3.bf16.msra.mxu1 %v773_v50 }
 0x1e5   :  { %v324_v42 = vpop.f32.mrf.mxu1 }
 0x1e6   :  { %v325_v43 = vadd.f32 %v589_v41, %v324_v42 }
 0x1e7   :  { %v690_v44 = vpop.f32.mrf.mxu1 }
 0x1e8   :  { %v330_v45 = vmax.f32 %v325_v43, 0.0 }
 0x1e9   :  { %v327_v46 = vpop.f32.mrf.mxu1 }
 0x1ea   :  { %v331_v47 = vpack.c.bf16 %v330_v45, %v330_v45 }
 0x1eb   :  { %v691_v48 = vpop.f32.mrf.mxu1 }
 0x1ec   :  { %709 = vmatmul.mubr.bf16.vlgmr.msra.gmra.mxu0 %v331_v47 }
 0x2ac   :  { %v437_v52 = vpop.f32.mrf.mxu0 }
 0x2ad   :  { %v438_v53 = vadd.f32 %v598_v51, %v437_v52 }
 0x2ae   :  { %v710_v54 = vpop.f32.mrf.mxu0 }
 0x2af   :  { %v443_v55 = vmax.f32 %v438_v53, 0.0 }
 0x2b0   :  { %v440_v56 = vpop.f32.mrf.mxu0 }
 0x2b1   :  { %v444_v57 = vpack.c.bf16 %v443_v55, %v443_v55 }
 0x2b2   :  { %v711_v58 = vpop.f32.mrf.mxu0 }
 0x2b3   :  { %729 = vmatmul.mubr.bf16.vlgmr.msra.gmra.mxu1 %v444_v57 }
 0x373   :  { %v550_v60 = vpop.f32.mrf.mxu1 }
 0x374   :  { %v551_v61 = vadd.f32 %v607_v59, %v550_v60 }
 0x375   :  { %v730_v62 = vpop.f32.mrf.mxu1 }
 0x376   :  { %v556_v63 = vmax.f32 %v551_v61, 0.0 }
 0x377   :  { %v553_v1 = vpop.f32.mrf.mxu1 }
 0x378   :  { %v558_v2 = vsub.f32 %v556_v63, %v1010_v14 }
 0x379   :  { %v731_v3 = vpop.f32.mrf.mxu1 }
 0x37a   :  { %v560_v4 = vmul.f32 %v559_v0, %v558_v2 }
 0x37c   :  { %v561_v5 = vadd.f32 %v560_v4, %v1010_v14 }
 0x37e   :  { %562 = vst [vmem:[#allocation12] sm:$0xff] %v561_v5 }
 0x37f   :  { %885 = shalt.err (!%p882_p1)
}
 0x380   :  { %572 = dma.vmem_to_hbm [thread:$0]  %s570_s23, 128, %s1068_s10, [#allocation5]  }
 0x381   :  { %900 = dma.done.wait [#allocation5], 128  }
 0x382   :  { %901 = vsyncadd [#allocation5], 4294967168 }
 0x383   :  { %576 = vsyncpa [#allocation4], 1 }
 0x384   :  { %577 = vsyncpa [#allocation7], 1 }
 0x385   :  { %578 = vsyncpa [#allocation10], 1 }
 0x386   :  { %579 = vsyncpa [#allocation5], 1 }

</bundles_post_ra>
